<compile_context>
chip_gen: v7x
topology: tpu7x:2x2x1
jax: 0.10.0
libtpu: 0.0.40
codegen_flags: <defaults>
</compile_context>

<pallas_src>
import functools

import numpy as np

import jax
import jax.numpy as jnp
from jax import lax
from jax.experimental import pallas as pl
from jax.experimental.pallas import tpu as pltpu


def ptf_kernel(*refs, use_mask):
    # refs (inputs): x (B,T,n_obs) [, mask (B,T,n_obs)], h0 (1,H), At (H,H) == A.T
    # refs (outputs, lane-flattened, full-H per step):
    #   exp (B,T*H), st (B,T*H), dlt (B,T*H), pdlt (B,T*H), fc (B,F*H), fs (B,F*H)
    if use_mask:
        (x_ref, m_ref, h0_ref, At_ref,
         exp_ref, st_ref, dlt_ref, pdlt_ref, fc_ref, fs_ref) = refs
    else:
        (x_ref, h0_ref, At_ref,
         exp_ref, st_ref, dlt_ref, pdlt_ref, fc_ref, fs_ref) = refs
        m_ref = None

    B, T, n_obs = x_ref.shape
    H = At_ref.shape[0]
    F = fs_ref.shape[-1] // H

    At = At_ref[...]                                   # (H, H) == A.T (hoisted transpose)
    h0 = h0_ref[...].astype(jnp.float32)               # (1, H)

    # Hoist bulk input loads out of the unrolled loop and widen to H lanes ONCE
    # (register/VMEM work only -- HBM traffic stays at n_obs width).
    def widen(a):                                      # (B, T, n_obs) -> (B, T, H)
        if n_obs == H:
            return a
        tail = jnp.zeros((B, T, H - n_obs), jnp.float32)
        return jnp.concatenate([a, tail], axis=-1)

    x_wide = widen(x_ref[...].astype(jnp.float32))
    m_wide = widen(m_ref[...].astype(jnp.float32)) if use_mask else None

    # Lane mask selecting the observed part of the state (ConMat = [I | 0]).
    lane = lax.broadcasted_iota(jnp.int32, (B, H), 1)
    obs_mask = (lane < n_obs).astype(jnp.float32)      # (B, H)

    state = jnp.broadcast_to(h0, (B, H))

    st_steps = [state]
    exp_steps, dlt_steps, pdlt_steps = [], [], []

    # ---- teacher-forcing recurrence (fully unrolled, one MXU matmul per step) ----
    for t in range(T - 1):
        y_w = state * obs_mask                         # y_hat, zero beyond n_obs
        d_w = x_wide[:, t, :] - y_w                    # delta  (zero beyond n_obs)
        pd_w = d_w * m_wide[:, t, :] if use_mask else d_w
        # TODO(synk): candidate further opt per review -- keep A.T staged in the MXU
        # weight registers (pltpu.matmul_push_rhs/acc_lhs/pop) or move this 32x32
        # serial matmul to VPU rank-1 accumulates; needs bundle-level measurement,
        # jnp.dot kept for guaranteed lowering.
        nxt = jnp.dot(jnp.tanh(state + pd_w), At,      # tanh(state + pdelta@ConMat) @ A.T
                      preferred_element_type=jnp.float32)
        exp_steps.append(y_w)
        dlt_steps.append(d_w)
        pdlt_steps.append(pd_w)
        st_steps.append(nxt)
        state = nxt

    # ---- last timestep (reference reuses the stale loop index t == T-2 for the
    #      observation in the delta term -- reproduced here) ----
    y_w = state * obs_mask
    d_w = x_wide[:, T - 2, :] - y_w
    pd_w = d_w * m_wide[:, T - 1, :] if use_mask else d_w
    exp_steps.append(y_w)
    dlt_steps.append(d_w)
    pdlt_steps.append(pd_w)

    # ---- closed-loop forecast roll-out (fully unrolled) ----
    fs_steps = [state]
    fc_steps = []
    f = state
    for t in range(1, F):
        fc_steps.append(f * obs_mask)                  # future_state[t-1] @ ConMat.T
        f = jnp.dot(jnp.tanh(f), At, preferred_element_type=jnp.float32)
        fs_steps.append(f)
    fc_steps.append(f * obs_mask)                      # forecasts[:, F-1]

    # ---- single lane-dense stores (T*H = 256 / F*H = 128 lanes, unmasked) ----
    exp_ref[...] = jnp.concatenate(exp_steps, axis=-1)
    st_ref[...] = jnp.concatenate(st_steps, axis=-1)
    dlt_ref[...] = jnp.concatenate(dlt_steps, axis=-1)
    pdlt_ref[...] = jnp.concatenate(pdlt_steps, axis=-1)
    fc_ref[...] = jnp.concatenate(fc_steps, axis=-1)
    fs_ref[...] = jnp.concatenate(fs_steps, axis=-1)


def _pick_batch_tile(B):
    # Largest batch tile that divides B and keeps (bt, lanes) blocks legal
    # ((8,128)-divisible) when tiling; falls back to a single whole-B block.
    for bt in (512, 256, 128, 64, 32, 16, 8):
        if B % bt == 0:
            return bt
    return B


@functools.partial(jax.jit, static_argnames=("forecast_horizon", "prob"))
def ptf_forward(data_window, h0, A, ConMat, prob=0.0, forecast_horizon=4,
                dropout_key=None):
    """data_window: (B, T, n_obs) batch-major (PyTorch layout).

    Returns (expectations, states, delta_terms, partial_delta_terms, forecasts,
    future_states), all batch-major, matching PTF_Model.forward.

    NOTE: the kernel hard-codes the fixed HCNN connection matrix ConMat = [I | 0];
    `ConMat` is accepted only for interface parity with the PyTorch module.
    """
    del ConMat  # structure exploited inside the kernel (fixed, non-trainable)

    B, T, n_obs = data_window.shape
    H = A.shape[0]
    F = int(forecast_horizon)
    if T < 2:
        raise ValueError("sequence length must be >= 2 (reference indexes t = T-2)")
    if F < 1:
        raise ValueError("forecast_horizon must be >= 1")
    if n_obs > H:
        raise ValueError("n_obs must be <= n_hid_vars")

    use_mask = float(prob) > 0.0
    x = data_window.astype(jnp.float32)                 # (B, T, n_obs) -- no padding
    A_t = jnp.transpose(A.astype(jnp.float32))          # A.T, hoisted once
    h0f = h0.astype(jnp.float32)

    inputs = [x]
    if use_mask:
        # ptf_dropout as inverted dropout (ones / (1-prob) kept, 0 dropped).
        if dropout_key is None:
            # TODO(synk): deterministic default key; pass a fresh key per call for
            # truly random teacher-forcing dropout.
            dropout_key = jax.random.PRNGKey(123)
        keep = jax.random.bernoulli(dropout_key, 1.0 - prob, (B, T, n_obs))
        inputs.append(keep.astype(jnp.float32) / (1.0 - prob))
    inputs += [h0f, A_t]

    bt = _pick_batch_tile(B)
    grid = (B // bt,)

    bmap3 = lambda b: (b, 0, 0)
    bmap2 = lambda b: (b, 0)
    fixed2 = lambda b: (0, 0)

    in_specs = [pl.BlockSpec((bt, T, n_obs), bmap3)]
    if use_mask:
        in_specs.append(pl.BlockSpec((bt, T, n_obs), bmap3))
    in_specs += [pl.BlockSpec((1, H), fixed2), pl.BlockSpec((H, H), fixed2)]

    out_shapes = (
        jax.ShapeDtypeStruct((B, T * H), jnp.float32),   # expectations (H-padded)
        jax.ShapeDtypeStruct((B, T * H), jnp.float32),   # states
        jax.ShapeDtypeStruct((B, T * H), jnp.float32),   # delta_terms (H-padded)
        jax.ShapeDtypeStruct((B, T * H), jnp.float32),   # partial_delta_terms (H-padded)
        jax.ShapeDtypeStruct((B, F * H), jnp.float32),   # forecasts (H-padded)
        jax.ShapeDtypeStruct((B, F * H), jnp.float32),   # future_states
    )
    out_specs = (
        pl.BlockSpec((bt, T * H), bmap2),
        pl.BlockSpec((bt, T * H), bmap2),
        pl.BlockSpec((bt, T * H), bmap2),
        pl.BlockSpec((bt, T * H), bmap2),
        pl.BlockSpec((bt, F * H), bmap2),
        pl.BlockSpec((bt, F * H), bmap2),
    )

    outs = pl.pallas_call(
        functools.partial(ptf_kernel, use_mask=use_mask),
        grid=grid,
        out_shape=out_shapes,
        in_specs=in_specs,
        out_specs=out_specs,
        compiler_params=pltpu.CompilerParams(dimension_semantics=("parallel",)),
    )(*inputs)

    exp_f, st_f, dlt_f, pdlt_f, fc_f, fs_f = outs
    expectations = exp_f.reshape(B, T, H)[:, :, :n_obs]
    states = st_f.reshape(B, T, H)
    delta_terms = dlt_f.reshape(B, T, H)[:, :, :n_obs]
    partial_delta_terms = pdlt_f.reshape(B, T, H)[:, :, :n_obs]
    forecasts = fc_f.reshape(B, F, H)[:, :, :n_obs]
    future_states = fs_f.reshape(B, F, H)
    return (expectations, states, delta_terms, partial_delta_terms,
            forecasts, future_states)


def make_params(n_obs, n_hid_vars, s0_nature="zeros_", init_range=(-0.75, 0.75),
                key=jax.random.PRNGKey(0)):
    """Deterministic parameter construction mirroring PTF_Model.__init__ / ptf_cell."""
    k_a, k_h = jax.random.split(key)
    low, high = init_range
    A = jax.random.uniform(k_a, (n_hid_vars, n_hid_vars), jnp.float32,
                           minval=low, maxval=high)
    # ConMat = [I_{n_obs} | 0]  (fixed connection matrix of the HCNN)
    ConMat = jnp.concatenate(
        [jnp.eye(n_obs, dtype=jnp.float32),
         jnp.zeros((n_obs, n_hid_vars - n_obs), jnp.float32)], axis=1)
    if s0_nature.lower() == "zeros_":
        h0 = jnp.zeros((1, n_hid_vars), jnp.float32)
    elif s0_nature.lower() == "random_":
        h0 = jax.random.uniform(k_h, (1, n_hid_vars), jnp.float32,
                                minval=low, maxval=high)
    else:
        raise ValueError("s0_nature must be either 'zeros_' or 'random_'")
    return A, ConMat, h0


def ptf_reference(data_window, h0, A, ConMat, mask, forecast_horizon):
    """Pure-JAX reference matching PTF_Model.forward (general-ConMat formulation)."""
    B, T, n_obs = data_window.shape
    H = A.shape[0]
    F = int(forecast_horizon)
    state = jnp.broadcast_to(h0, (B, H)).astype(jnp.float32)
    states = [state]
    exps, dlts, pdlts = [], [], []
    for t in range(T - 1):
        y = state @ ConMat.T
        d = data_window[:, t, :] - y
        pd = d * mask[:, t, :]
        state = jnp.tanh(state + pd @ ConMat) @ A.T
        exps.append(y); dlts.append(d); pdlts.append(pd); states.append(state)
    y = state @ ConMat.T
    d = data_window[:, T - 2, :] - y            # stale-index behavior of reference
    pd = d * mask[:, T - 1, :]
    exps.append(y); dlts.append(d); pdlts.append(pd)
    f = state
    fstates = [f]
    fcs = []
    for t in range(1, F):
        fcs.append(f @ ConMat.T)
        f = jnp.tanh(f) @ A.T
        fstates.append(f)
    fcs.append(f @ ConMat.T)
    stack1 = lambda xs: jnp.stack(xs, axis=1)
    return (stack1(exps), stack1(states), stack1(dlts), stack1(pdlts),
            stack1(fcs), stack1(fstates))


if __name__ == "__main__":
    n_obs, n_hid_vars = 4, 32
    batch, seq = 2, 8
    forecast_horizon = 4

    key = jax.random.PRNGKey(0)
    k_data, k_params = jax.random.split(key)

    data_window = jax.random.normal(k_data, (batch, seq, n_obs), jnp.float32)
    A, ConMat, h0 = make_params(n_obs, n_hid_vars, "zeros_", (-0.75, 0.75), k_params)

    outs = ptf_forward(data_window, h0, A, ConMat, prob=0.0,
                       forecast_horizon=forecast_horizon)
    outs = jax.block_until_ready(outs)

    expectations, states, delta_terms, partial_delta_terms, forecasts, future_states = outs
    assert expectations.shape == (batch, seq, n_obs)
    assert states.shape == (batch, seq, n_hid_vars)
    assert delta_terms.shape == (batch, seq, n_obs)
    assert partial_delta_terms.shape == (batch, seq, n_obs)
    assert forecasts.shape == (batch, forecast_horizon, n_obs)
    assert future_states.shape == (batch, forecast_horizon, n_hid_vars)

    # Correctness check against a pure-JAX reference (prob = 0 -> mask of ones).
    mask = jnp.ones((batch, seq, n_obs), jnp.float32)
    ref = ptf_reference(data_window, h0, A, ConMat, mask, forecast_horizon)
    for got, want in zip(outs, ref):
        np.testing.assert_allclose(np.asarray(got), np.asarray(want),
                                   rtol=1e-4, atol=1e-4)

    print("KERNEL_OK")
</pallas_src>

<mosaic_0001>
module attributes {stable_mosaic.version = 11 : i64} {
  func.func @ptf_kernel(%arg0: i32, %arg1: memref<2x8x4xf32, #tpu.memory_space<vmem>>, %arg2: memref<1x32xf32, #tpu.memory_space<vmem>>, %arg3: memref<32x32xf32, #tpu.memory_space<vmem>>, %arg4: memref<2x256xf32, #tpu.memory_space<vmem>>, %arg5: memref<2x256xf32, #tpu.memory_space<vmem>>, %arg6: memref<2x256xf32, #tpu.memory_space<vmem>>, %arg7: memref<2x256xf32, #tpu.memory_space<vmem>>, %arg8: memref<2x128xf32, #tpu.memory_space<vmem>>, %arg9: memref<2x128xf32, #tpu.memory_space<vmem>>) attributes {dimension_semantics = [#tpu.dimension_semantics<parallel>], iteration_bounds = array<i64: 1>, scalar_prefetch = 0 : i64, scratch_operands = 0 : i64, tpu.core_type = #tpu.core_type<tc>, window_params = [{transform_indices = @transform_0, window_bounds = array<i64: 2, 8, 4>}, {pipeline_mode = #tpu.pipeline_mode<synchronous>, transform_indices = @transform_1, window_bounds = array<i64: 1, 32>}, {pipeline_mode = #tpu.pipeline_mode<synchronous>, transform_indices = @transform_2, window_bounds = array<i64: 32, 32>}, {transform_indices = @transform_3, window_bounds = array<i64: 2, 256>}, {transform_indices = @transform_4, window_bounds = array<i64: 2, 256>}, {transform_indices = @transform_5, window_bounds = array<i64: 2, 256>}, {transform_indices = @transform_6, window_bounds = array<i64: 2, 256>}, {transform_indices = @transform_7, window_bounds = array<i64: 2, 128>}, {transform_indices = @transform_8, window_bounds = array<i64: 2, 128>}]} {
    %c0 = arith.constant 0 : index
    %c0_0 = arith.constant 0 : index
    %0 = vector.load %arg3[%c0, %c0_0] : memref<32x32xf32, #tpu.memory_space<vmem>>, vector<32x32xf32>
    %c0_1 = arith.constant 0 : index
    %c0_2 = arith.constant 0 : index
    %1 = vector.load %arg2[%c0_1, %c0_2] : memref<1x32xf32, #tpu.memory_space<vmem>>, vector<1x32xf32>
    %c0_3 = arith.constant 0 : index
    %c0_4 = arith.constant 0 : index
    %c0_5 = arith.constant 0 : index
    %2 = vector.load %arg1[%c0_3, %c0_4, %c0_5] : memref<2x8x4xf32, #tpu.memory_space<vmem>>, vector<2x8x4xf32>
    %cst = arith.constant 0.000000e+00 : f32
    %3 = vector.broadcast %cst : f32 to vector<2x8x28xf32>
    %4 = tpu.concatenate %2, %3 in 2 : vector<2x8x4xf32>, vector<2x8x28xf32> -> vector<2x8x32xf32>
    %5 = tpu.iota {dimensions = array<i32: 1>} : vector<2x32xi32>
    %c4_i32 = arith.constant 4 : i32
    %6 = vector.broadcast %c4_i32 : i32 to vector<2x32xi32>
    %7 = arith.cmpi slt, %5, %6 : vector<2x32xi32>
    %8 = arith.extui %7 : vector<2x32xi1> to vector<2x32xi32>
    %9 = arith.sitofp %8 : vector<2x32xi32> to vector<2x32xf32>
    %10 = vector.shape_cast %1 : vector<1x32xf32> to vector<1x32xf32>
    %11 = vector.broadcast %10 : vector<1x32xf32> to vector<2x32xf32>
    %12 = arith.mulf %11, %9 : vector<2x32xf32>
    %13 = vector.extract_strided_slice %4 {offsets = [0, 0, 0], sizes = [2, 1, 32], strides = [1, 1, 1]} : vector<2x8x32xf32> to vector<2x1x32xf32>
    %14 = vector.shape_cast %13 : vector<2x1x32xf32> to vector<2x32xf32>
    %15 = arith.subf %14, %12 : vector<2x32xf32>
    %16 = arith.addf %11, %15 : vector<2x32xf32>
    %17 = math.tanh %16 : vector<2x32xf32>
    %cst_6 = arith.constant dense<0.000000e+00> : vector<2x32xf32>
    %18 = tpu.matmul %17, %0, %cst_6 {dimension_numbers = #tpu.dot_dimension_numbers<[1], [0], [0], [1], [0, 0, 1, 1], [], []>} : vector<2x32xf32>, vector<32x32xf32>, vector<2x32xf32> -> vector<2x32xf32>
    %19 = arith.mulf %18, %9 : vector<2x32xf32>
    %20 = vector.extract_strided_slice %4 {offsets = [0, 1, 0], sizes = [2, 1, 32], strides = [1, 1, 1]} : vector<2x8x32xf32> to vector<2x1x32xf32>
    %21 = vector.shape_cast %20 : vector<2x1x32xf32> to vector<2x32xf32>
    %22 = arith.subf %21, %19 : vector<2x32xf32>
    %23 = arith.addf %18, %22 : vector<2x32xf32>
    %24 = math.tanh %23 : vector<2x32xf32>
    %cst_7 = arith.constant dense<0.000000e+00> : vector<2x32xf32>
    %25 = tpu.matmul %24, %0, %cst_7 {dimension_numbers = #tpu.dot_dimension_numbers<[1], [0], [0], [1], [0, 0, 1, 1], [], []>} : vector<2x32xf32>, vector<32x32xf32>, vector<2x32xf32> -> vector<2x32xf32>
    %26 = arith.mulf %25, %9 : vector<2x32xf32>
    %27 = vector.extract_strided_slice %4 {offsets = [0, 2, 0], sizes = [2, 1, 32], strides = [1, 1, 1]} : vector<2x8x32xf32> to vector<2x1x32xf32>
    %28 = vector.shape_cast %27 : vector<2x1x32xf32> to vector<2x32xf32>
    %29 = arith.subf %28, %26 : vector<2x32xf32>
    %30 = arith.addf %25, %29 : vector<2x32xf32>
    %31 = math.tanh %30 : vector<2x32xf32>
    %cst_8 = arith.constant dense<0.000000e+00> : vector<2x32xf32>
    %32 = tpu.matmul %31, %0, %cst_8 {dimension_numbers = #tpu.dot_dimension_numbers<[1], [0], [0], [1], [0, 0, 1, 1], [], []>} : vector<2x32xf32>, vector<32x32xf32>, vector<2x32xf32> -> vector<2x32xf32>
    %33 = arith.mulf %32, %9 : vector<2x32xf32>
    %34 = vector.extract_strided_slice %4 {offsets = [0, 3, 0], sizes = [2, 1, 32], strides = [1, 1, 1]} : vector<2x8x32xf32> to vector<2x1x32xf32>
    %35 = vector.shape_cast %34 : vector<2x1x32xf32> to vector<2x32xf32>
    %36 = arith.subf %35, %33 : vector<2x32xf32>
    %37 = arith.addf %32, %36 : vector<2x32xf32>
    %38 = math.tanh %37 : vector<2x32xf32>
    %cst_9 = arith.constant dense<0.000000e+00> : vector<2x32xf32>
    %39 = tpu.matmul %38, %0, %cst_9 {dimension_numbers = #tpu.dot_dimension_numbers<[1], [0], [0], [1], [0, 0, 1, 1], [], []>} : vector<2x32xf32>, vector<32x32xf32>, vector<2x32xf32> -> vector<2x32xf32>
    %40 = arith.mulf %39, %9 : vector<2x32xf32>
    %41 = vector.extract_strided_slice %4 {offsets = [0, 4, 0], sizes = [2, 1, 32], strides = [1, 1, 1]} : vector<2x8x32xf32> to vector<2x1x32xf32>
    %42 = vector.shape_cast %41 : vector<2x1x32xf32> to vector<2x32xf32>
    %43 = arith.subf %42, %40 : vector<2x32xf32>
    %44 = arith.addf %39, %43 : vector<2x32xf32>
    %45 = math.tanh %44 : vector<2x32xf32>
    %cst_10 = arith.constant dense<0.000000e+00> : vector<2x32xf32>
    %46 = tpu.matmul %45, %0, %cst_10 {dimension_numbers = #tpu.dot_dimension_numbers<[1], [0], [0], [1], [0, 0, 1, 1], [], []>} : vector<2x32xf32>, vector<32x32xf32>, vector<2x32xf32> -> vector<2x32xf32>
    %47 = arith.mulf %46, %9 : vector<2x32xf32>
    %48 = vector.extract_strided_slice %4 {offsets = [0, 5, 0], sizes = [2, 1, 32], strides = [1, 1, 1]} : vector<2x8x32xf32> to vector<2x1x32xf32>
    %49 = vector.shape_cast %48 : vector<2x1x32xf32> to vector<2x32xf32>
    %50 = arith.subf %49, %47 : vector<2x32xf32>
    %51 = arith.addf %46, %50 : vector<2x32xf32>
    %52 = math.tanh %51 : vector<2x32xf32>
    %cst_11 = arith.constant dense<0.000000e+00> : vector<2x32xf32>
    %53 = tpu.matmul %52, %0, %cst_11 {dimension_numbers = #tpu.dot_dimension_numbers<[1], [0], [0], [1], [0, 0, 1, 1], [], []>} : vector<2x32xf32>, vector<32x32xf32>, vector<2x32xf32> -> vector<2x32xf32>
    %54 = arith.mulf %53, %9 : vector<2x32xf32>
    %55 = vector.extract_strided_slice %4 {offsets = [0, 6, 0], sizes = [2, 1, 32], strides = [1, 1, 1]} : vector<2x8x32xf32> to vector<2x1x32xf32>
    %56 = vector.shape_cast %55 : vector<2x1x32xf32> to vector<2x32xf32>
    %57 = arith.subf %56, %54 : vector<2x32xf32>
    %58 = arith.addf %53, %57 : vector<2x32xf32>
    %59 = math.tanh %58 : vector<2x32xf32>
    %cst_12 = arith.constant dense<0.000000e+00> : vector<2x32xf32>
    %60 = tpu.matmul %59, %0, %cst_12 {dimension_numbers = #tpu.dot_dimension_numbers<[1], [0], [0], [1], [0, 0, 1, 1], [], []>} : vector<2x32xf32>, vector<32x32xf32>, vector<2x32xf32> -> vector<2x32xf32>
    %61 = arith.mulf %60, %9 : vector<2x32xf32>
    %62 = vector.extract_strided_slice %4 {offsets = [0, 6, 0], sizes = [2, 1, 32], strides = [1, 1, 1]} : vector<2x8x32xf32> to vector<2x1x32xf32>
    %63 = vector.shape_cast %62 : vector<2x1x32xf32> to vector<2x32xf32>
    %64 = arith.subf %63, %61 : vector<2x32xf32>
    %65 = arith.mulf %60, %9 : vector<2x32xf32>
    %66 = math.tanh %60 : vector<2x32xf32>
    %cst_13 = arith.constant dense<0.000000e+00> : vector<2x32xf32>
    %67 = tpu.matmul %66, %0, %cst_13 {dimension_numbers = #tpu.dot_dimension_numbers<[1], [0], [0], [1], [0, 0, 1, 1], [], []>} : vector<2x32xf32>, vector<32x32xf32>, vector<2x32xf32> -> vector<2x32xf32>
    %68 = arith.mulf %67, %9 : vector<2x32xf32>
    %69 = math.tanh %67 : vector<2x32xf32>
    %cst_14 = arith.constant dense<0.000000e+00> : vector<2x32xf32>
    %70 = tpu.matmul %69, %0, %cst_14 {dimension_numbers = #tpu.dot_dimension_numbers<[1], [0], [0], [1], [0, 0, 1, 1], [], []>} : vector<2x32xf32>, vector<32x32xf32>, vector<2x32xf32> -> vector<2x32xf32>
    %71 = arith.mulf %70, %9 : vector<2x32xf32>
    %72 = math.tanh %70 : vector<2x32xf32>
    %cst_15 = arith.constant dense<0.000000e+00> : vector<2x32xf32>
    %73 = tpu.matmul %72, %0, %cst_15 {dimension_numbers = #tpu.dot_dimension_numbers<[1], [0], [0], [1], [0, 0, 1, 1], [], []>} : vector<2x32xf32>, vector<32x32xf32>, vector<2x32xf32> -> vector<2x32xf32>
    %74 = arith.mulf %73, %9 : vector<2x32xf32>
    %75 = tpu.concatenate %12, %19, %26, %33, %40, %47, %54, %61 in 1 : vector<2x32xf32>, vector<2x32xf32>, vector<2x32xf32>, vector<2x32xf32>, vector<2x32xf32>, vector<2x32xf32>, vector<2x32xf32>, vector<2x32xf32> -> vector<2x256xf32>
    %c0_16 = arith.constant 0 : index
    %c0_17 = arith.constant 0 : index
    %76 = vector.load %arg4[%c0_16, %c0_17] : memref<2x256xf32, #tpu.memory_space<vmem>>, vector<2x256xf32>
    tpu.vector_store %arg4[%c0_16, %c0_17], %75 {strides = array<i32>} : memref<2x256xf32, #tpu.memory_space<vmem>>, vector<2x256xf32>,
    %77 = tpu.concatenate %11, %18, %25, %32, %39, %46, %53, %60 in 1 : vector<2x32xf32>, vector<2x32xf32>, vector<2x32xf32>, vector<2x32xf32>, vector<2x32xf32>, vector<2x32xf32>, vector<2x32xf32>, vector<2x32xf32> -> vector<2x256xf32>
    %c0_18 = arith.constant 0 : index
    %c0_19 = arith.constant 0 : index
    %78 = vector.load %arg5[%c0_18, %c0_19] : memref<2x256xf32, #tpu.memory_space<vmem>>, vector<2x256xf32>
    tpu.vector_store %arg5[%c0_18, %c0_19], %77 {strides = array<i32>} : memref<2x256xf32, #tpu.memory_space<vmem>>, vector<2x256xf32>,
    %79 = tpu.concatenate %15, %22, %29, %36, %43, %50, %57, %64 in 1 : vector<2x32xf32>, vector<2x32xf32>, vector<2x32xf32>, vector<2x32xf32>, vector<2x32xf32>, vector<2x32xf32>, vector<2x32xf32>, vector<2x32xf32> -> vector<2x256xf32>
    %c0_20 = arith.constant 0 : index
    %c0_21 = arith.constant 0 : index
    %80 = vector.load %arg6[%c0_20, %c0_21] : memref<2x256xf32, #tpu.memory_space<vmem>>, vector<2x256xf32>
    tpu.vector_store %arg6[%c0_20, %c0_21], %79 {strides = array<i32>} : memref<2x256xf32, #tpu.memory_space<vmem>>, vector<2x256xf32>,
    %81 = tpu.concatenate %15, %22, %29, %36, %43, %50, %57, %64 in 1 : vector<2x32xf32>, vector<2x32xf32>, vector<2x32xf32>, vector<2x32xf32>, vector<2x32xf32>, vector<2x32xf32>, vector<2x32xf32>, vector<2x32xf32> -> vector<2x256xf32>
    %c0_22 = arith.constant 0 : index
    %c0_23 = arith.constant 0 : index
    %82 = vector.load %arg7[%c0_22, %c0_23] : memref<2x256xf32, #tpu.memory_space<vmem>>, vector<2x256xf32>
    tpu.vector_store %arg7[%c0_22, %c0_23], %81 {strides = array<i32>} : memref<2x256xf32, #tpu.memory_space<vmem>>, vector<2x256xf32>,
    %83 = tpu.concatenate %65, %68, %71, %74 in 1 : vector<2x32xf32>, vector<2x32xf32>, vector<2x32xf32>, vector<2x32xf32> -> vector<2x128xf32>
    %c0_24 = arith.constant 0 : index
    %c0_25 = arith.constant 0 : index
    %84 = vector.load %arg8[%c0_24, %c0_25] : memref<2x128xf32, #tpu.memory_space<vmem>>, vector<2x128xf32>
    tpu.vector_store %arg8[%c0_24, %c0_25], %83 {strides = array<i32>} : memref<2x128xf32, #tpu.memory_space<vmem>>, vector<2x128xf32>,
    %85 = tpu.concatenate %60, %67, %70, %73 in 1 : vector<2x32xf32>, vector<2x32xf32>, vector<2x32xf32>, vector<2x32xf32> -> vector<2x128xf32>
    %c0_26 = arith.constant 0 : index
    %c0_27 = arith.constant 0 : index
    %86 = vector.load %arg9[%c0_26, %c0_27] : memref<2x128xf32, #tpu.memory_space<vmem>>, vector<2x128xf32>
    tpu.vector_store %arg9[%c0_26, %c0_27], %85 {strides = array<i32>} : memref<2x128xf32, #tpu.memory_space<vmem>>, vector<2x128xf32>,
    return
  }
  func.func @transform_0(%arg0: i32) -> (i32, i32, i32) {
    %c0_i32 = arith.constant 0 : i32
    %c0_i32_0 = arith.constant 0 : i32
    %c0_i32_1 = arith.constant 0 : i32
    return %arg0, %c0_i32, %c0_i32_0 : i32, i32, i32
  }
  func.func @transform_1(%arg0: i32) -> (i32, i32) {
    %c0_i32 = arith.constant 0 : i32
    %c0_i32_0 = arith.constant 0 : i32
    %c0_i32_1 = arith.constant 0 : i32
    return %c0_i32, %c0_i32_0 : i32, i32
  }
  func.func @transform_2(%arg0: i32) -> (i32, i32) {
    %c0_i32 = arith.constant 0 : i32
    %c0_i32_0 = arith.constant 0 : i32
    %c0_i32_1 = arith.constant 0 : i32
    return %c0_i32, %c0_i32_0 : i32, i32
  }
  func.func @transform_3(%arg0: i32) -> (i32, i32) {
    %c0_i32 = arith.constant 0 : i32
    %c0_i32_0 = arith.constant 0 : i32
    return %arg0, %c0_i32 : i32, i32
  }
  func.func @transform_4(%arg0: i32) -> (i32, i32) {
    %c0_i32 = arith.constant 0 : i32
    %c0_i32_0 = arith.constant 0 : i32
    return %arg0, %c0_i32 : i32, i32
  }
  func.func @transform_5(%arg0: i32) -> (i32, i32) {
    %c0_i32 = arith.constant 0 : i32
    %c0_i32_0 = arith.constant 0 : i32
    return %arg0, %c0_i32 : i32, i32
  }
  func.func @transform_6(%arg0: i32) -> (i32, i32) {
    %c0_i32 = arith.constant 0 : i32
    %c0_i32_0 = arith.constant 0 : i32
    return %arg0, %c0_i32 : i32, i32
  }
  func.func @transform_7(%arg0: i32) -> (i32, i32) {
    %c0_i32 = arith.constant 0 : i32
    %c0_i32_0 = arith.constant 0 : i32
    return %arg0, %c0_i32 : i32, i32
  }
  func.func @transform_8(%arg0: i32) -> (i32, i32) {
    %c0_i32 = arith.constant 0 : i32
    %c0_i32_0 = arith.constant 0 : i32
    return %arg0, %c0_i32 : i32, i32
  }
}

</mosaic_0001>

<bundles_post_ra>
// kernel: ptf_forward.1
= control target key start
LH: loop header
LB: loop body
LE: loop exit
PB: predicated region body
PF: predicated region fallthrough
CT: control target
= control target key end

     0   :  { %v30_v0 = vlaneseq  ;;  %v1331_v1 = vmov 0.0|0.0   ;;  %vm1332_vm0 = vmmov 0   ;;  %v1333_v5 = vmov 0.0   ;;  %s1625_s2 = inlined_call_operand.vmem [shape: f32[32,32], index: 2, kind: input, shape index: {}]   ;;  %s1626_s0 = inlined_call_operand.vmem [shape: f32[2,8,4], index: 0, kind: input, shape index: {}]   ;;  %s1627_s1 = inlined_call_operand.vmem [shape: f32[1,32], index: 1, kind: input, shape index: {}]   ;;  %s1628_s4 = inlined_call_operand.vmem [shape: f32[2,256], index: 4, kind: output, shape index: {1}]   ;;  %s1629_s3 = inlined_call_operand.vmem [shape: f32[2,256], index: 3, kind: output, shape index: {0}]   ;;  %s1630_s5 = inlined_call_operand.vmem [shape: f32[2,256], index: 5, kind: output, shape index: {2}]   ;;  %s1631_s6 = inlined_call_operand.vmem [shape: f32[2,256], index: 6, kind: output, shape index: {3}]   ;;  %s1632_s8 = inlined_call_operand.vmem [shape: f32[2,128], index: 8, kind: output, shape index: {5}]   ;;  %s1633_s7 = inlined_call_operand.vmem [shape: f32[2,128], index: 7, kind: output, shape index: {4}]  }
   0x1   :  { %1245 = vmatprep.subr.bf16.mxu0 %v1331_v1  ;;  %v20_v2 = vld [vmem:[%s1625_s2] sm:$0xff]  ;;  %v21_v3 = vld [vmem:[%s1625_s2 + $0x8] sm:$0xff]  ;;  %v22_v4 = vld [vmem:[%s1625_s2 + $0x10] sm:$0xff]  ;;  %1143 = vmatprep.mubr.msk.f32.mxu0 %vm1332_vm0, %v1333_v5  ;;  %vm27_vm1 = vcmask 31744   ;;  %vm47_vm3 = vcmask 1041409   ;;  %vm52_vm4 = vcmask 261120  }
   0x2   :  { %v1394_v6 = vpack.c.bf16 %v21_v3, %v20_v2  ;;  %v23_v7 = vld [vmem:[%s1625_s2 + $0x18] sm:$0xff]  ;;  %v31_v8 = vand.u32 127, %v30_v0  ;;  %v25_v9 = vld [vmem:[%s1626_s0] sm:$0xff]  ;;  %1251 = vmatprep.subr.bf16.mxu1 %v1331_v1  ;;  %1154 = vmatprep.mubr.msk.f32.mxu1 %vm1332_vm0, %v1333_v5  ;;  %v26_v11 = vld [vmem:[%s1626_s0 + $0x8] sm:$0xff]  ;;  %s1334_s0 = smov 32   ;;  %s1336_s2 = smov 96  }
   0x3   :  { %v1408_v10 = vld [vmem:[%s1627_s1] ss:$0 sm:$0xff]  ;;  %v1414_v12 = vpack.c.bf16 %v23_v7, %v22_v4  ;;  %v1421_v14 = vsel %vm27_vm1, %v25_v9, 0.0  ;;  %v1423_v15 = vsel %vm27_vm1, %v26_v11, 0.0  ;;  %s1335_s1 = smov 64   ;;  %vm910_vm5 = vcmask 523264  }
   0x4   :  { %1247 = vmatpush3.bf16.msra.mxu0 %v1394_v6  ;;  %vm32_vm2 = vcmp.lt.s32.totalorder %v31_v8, 4  ;;  %1253 = vmatpush3.bf16.msra.mxu1 %v1394_v6  ;;  %vm912_vm6 = vcmask 785408  }
   0x5   :  { %1248 = vmatprep.subr.bf16.mxu0 %v1331_v1  ;;  %v1419_v13 = vsel %vm32_vm2, 1.0, %v1333_v5  ;;  %1254 = vmatprep.subr.bf16.mxu1 %v1331_v1 }
   0x6   :  { %v1428_v16 = vmul.f32 %v1408_v10, %v1419_v13 }
   0x8   :  { %1250 = vmatpush3.bf16.msra.mxu0 %v1414_v12  ;;  %v42_v17 = vsub.f32 %v1421_v14, %v1428_v16  ;;  %v43_v18 = vsub.f32 %v1423_v15, %v1428_v16  ;;  %1256 = vmatpush3.bf16.msra.mxu1 %v1414_v12 }
   0x9   :  { %1257 = vmatprep.subr.bf16.mxu0 %v1331_v1  ;;  %1263 = vmatprep.subr.bf16.mxu1 %v1331_v1 }
   0xa   :  { %v46_v19 = vrot.slane %v43_v18, 7 }
   0xc   :  { %v1439_v20 = vsel %vm47_vm3, %v46_v19, %v42_v17 }
   0xd   :  { %v50_v21 = vadd.f32 %v1408_v10, %v1439_v20 }
   0xf   :  { %1311 = vtanh.f32 %v50_v21 }
  0x19   :  { %v1312_v22 = vpop.eup %1311 }
  0x1a   :  { %1144 = vmatmul.mubr.msk.f32.vlgmr.msra.gmra.mrb[0].mxu0 %vm52_vm4, %v1312_v22 }
  0x1b   :  { %1259 = vmatpush3.bf16.msra.mxu0 %v1394_v6  ;;  %1165 = vmatprep.mubr.msk.f32.mxu0 %vm1332_vm0, %v1333_v5 }
  0x1c   :  { %1260 = vmatprep.subr.bf16.mxu0 %v1331_v1 }
  0x1f   :  { %1262 = vmatpush3.bf16.msra.mxu0 %v1414_v12 }
  0x20   :  { %1269 = vmatprep.subr.bf16.mxu0 %v1331_v1 }
  0xed   :  { %v122_v23 = vpop.f32.mrb[0].mxu0 }
  0xee   :  { %v126_v24 = vmul.f32 %v1419_v13, %v122_v23  ;;  %930 = vrot.lane.b32.xlu1 %v122_v23, %s1334_s0  ;;  %v1145_v25 = vpop.f32.mrb[1].mxu0 }
  0xf0   :  { %v128_v26 = vrot.slane %v126_v24, 7  ;;  %891 = vrot.lane.b32.xlu0 %v126_v24, %s1334_s0  ;;  %v132_v28 = vsub.f32 %v1423_v15, %v126_v24 }
  0xf2   :  { %v131_v27 = vsub.f32 %v1421_v14, %v128_v26 }
  0xf4   :  { %v135_v29 = vrot.slane %v131_v27, 1 }
  0xf6   :  { %v136_v30 = vsel %vm47_vm3, %v132_v28, %v135_v29 }
  0xf7   :  { %971 = vrot.lane.b32.xlu0 %v136_v30, %s1334_s0  ;;  %v138_v31 = vadd.f32 %v136_v30, %v122_v23 }
  0xf9   :  { %1313 = vtanh.f32 %v138_v31 }
 0x103   :  { %v1314_v32 = vpop.eup %1313 }
 0x104   :  { %1155 = vmatmul.mubr.msk.f32.vlgmr.msra.gmra.mrb[0].mxu1 %vm52_vm4, %v1314_v32 }
 0x105   :  { %1265 = vmatpush3.bf16.msra.mxu1 %v1394_v6  ;;  %1176 = vmatprep.mubr.msk.f32.mxu1 %vm1332_vm0, %v1333_v5 }
 0x106   :  { %1266 = vmatprep.subr.bf16.mxu1 %v1331_v1 }
 0x109   :  { %1268 = vmatpush3.bf16.msra.mxu1 %v1414_v12 }
 0x10a   :  { %1275 = vmatprep.subr.bf16.mxu1 %v1331_v1 }
 0x1d7   :  { %v209_v33 = vpop.f32.mrb[0].mxu1 }
 0x1d8   :  { %v213_v34 = vmul.f32 %v1419_v13, %v209_v33  ;;  %934 = vrot.lane.b32.xlu0 %v209_v33, %s1335_s1  ;;  %v1156_v35 = vpop.f32.mrb[1].mxu1 }
 0x1da   :  { %v215_v36 = vrot.slane %v213_v34, 6  ;;  %v216_v37 = vrot.slane %v213_v34, 7 }
 0x1dc   :  { %894 = vrot.lane.b32.xlu0 %v213_v34, %s1335_s1  ;;  %v219_v38 = vsub.f32 %v1421_v14, %v215_v36  ;;  %v220_v39 = vsub.f32 %v1423_v15, %v216_v37 }
 0x1de   :  { %v223_v40 = vrot.slane %v219_v38, 2  ;;  %v224_v41 = vrot.slane %v220_v39, 1 }
 0x1e0   :  { %v225_v42 = vsel %vm47_vm3, %v224_v41, %v223_v40 }
 0x1e1   :  { %974 = vrot.lane.b32.xlu0 %v225_v42, %s1335_s1  ;;  %v227_v43 = vadd.f32 %v225_v42, %v209_v33 }
 0x1e3   :  { %1315 = vtanh.f32 %v227_v43 }
 0x1ed   :  { %v1316_v44 = vpop.eup %1315 }
 0x1ee   :  { %1166 = vmatmul.mubr.msk.f32.vlgmr.msra.gmra.mrb[2].mxu0 %vm52_vm4, %v1316_v44 }
 0x1ef   :  { %1271 = vmatpush3.bf16.msra.mxu0 %v1394_v6  ;;  %1187 = vmatprep.mubr.msk.f32.mxu0 %vm1332_vm0, %v1333_v5 }
 0x1f0   :  { %1272 = vmatprep.subr.bf16.mxu0 %v1331_v1 }
 0x1f3   :  { %1274 = vmatpush3.bf16.msra.mxu0 %v1414_v12 }
 0x1f4   :  { %1281 = vmatprep.subr.bf16.mxu0 %v1331_v1 }
 0x2c1   :  { %v298_v45 = vpop.f32.mrb[2].mxu0 }
 0x2c2   :  { %v302_v46 = vmul.f32 %v1419_v13, %v298_v45  ;;  %938 = vrot.lane.b32.xlu0 %v298_v45, %s1336_s2  ;;  %v1167_v47 = vpop.f32.mrb[3].mxu0 }
 0x2c4   :  { %v304_v48 = vrot.slane %v302_v46, 5  ;;  %v305_v49 = vrot.slane %v302_v46, 6 }
 0x2c6   :  { %897 = vrot.lane.b32.xlu0 %v302_v46, %s1336_s2  ;;  %v308_v50 = vsub.f32 %v1421_v14, %v304_v48  ;;  %v309_v51 = vsub.f32 %v1423_v15, %v305_v49 }
 0x2c8   :  { %v312_v52 = vrot.slane %v308_v50, 3  ;;  %v313_v53 = vrot.slane %v309_v51, 2  ;;  %v931_v51 = vpop.permute.xlu1 %930 }
 0x2ca   :  { %v314_v54 = vsel %vm47_vm3, %v313_v53, %v312_v52 }
 0x2cb   :  { %977 = vrot.lane.b32.xlu0 %v314_v54, %s1336_s2  ;;  %v316_v55 = vadd.f32 %v314_v54, %v298_v45 }
 0x2cd   :  { %1317 = vtanh.f32 %v316_v55 }
 0x2d7   :  { %v1318_v56 = vpop.eup %1317 }
 0x2d8   :  { %1177 = vmatmul.mubr.msk.f32.vlgmr.msra.gmra.mrb[2].mxu1 %vm52_vm4, %v1318_v56 }
 0x2d9   :  { %1277 = vmatpush3.bf16.msra.mxu1 %v1394_v6  ;;  %1198 = vmatprep.mubr.msk.f32.mxu1 %vm1332_vm0, %v1333_v5 }
 0x2da   :  { %1278 = vmatprep.subr.bf16.mxu1 %v1331_v1 }
 0x2dd   :  { %1280 = vmatpush3.bf16.msra.mxu1 %v1414_v12 }
 0x2de   :  { %1287 = vmatprep.subr.bf16.mxu1 %v1331_v1 }
 0x3ab   :  { %v1492_v57 = vpop.f32.mrb[2].mxu1 }
 0x3ac   :  { %v1496_v58 = vmul.f32 %v1419_v13, %v1492_v57  ;;  %v1178_v59 = vpop.f32.mrb[3].mxu1 }
 0x3ae   :  { %v393_v60 = vrot.slane %v1496_v58, 4  ;;  %v394_v61 = vrot.slane %v1496_v58, 5 }
 0x3b0   :  { %v397_v62 = vsub.f32 %v1421_v14, %v393_v60  ;;  %v398_v63 = vsub.f32 %v1423_v15, %v394_v61 }
 0x3b2   :  { %v401_v0 = vrot.slane %v397_v62, 4  ;;  %v402_v2 = vrot.slane %v398_v63, 3 }
 0x3b4   :  { %v1503_v3 = vsel %vm47_vm3, %v402_v2, %v401_v0 }
 0x3b5   :  { %v405_v4 = vadd.f32 %v1503_v3, %v1492_v57 }
 0x3b7   :  { %1319 = vtanh.f32 %v405_v4 }
 0x3c1   :  { %v1320_v7 = vpop.eup %1319 }
 0x3c2   :  { %1188 = vmatmul.mubr.msk.f32.vlgmr.msra.gmra.mrb[4].mxu0 %vm52_vm4, %v1320_v7 }
 0x3c3   :  { %1283 = vmatpush3.bf16.msra.mxu0 %v1394_v6  ;;  %1209 = vmatprep.mubr.msk.f32.mxu0 %vm1332_vm0, %v1333_v5 }
 0x3c4   :  { %1284 = vmatprep.subr.bf16.mxu0 %v1331_v1 }
 0x3c7   :  { %1286 = vmatpush3.bf16.msra.mxu0 %v1414_v12 }
 0x3c8   :  { %1293 = vmatprep.subr.bf16.mxu0 %v1331_v1 }
 0x495   :  { %v476_v8 = vpop.f32.mrb[4].mxu0 }
 0x496   :  { %v480_v9 = vmul.f32 %v1419_v13, %v476_v8  ;;  %942 = vrot.lane.b32.xlu1 %v476_v8, %s1334_s0  ;;  %v1189_v11 = vpop.f32.mrb[5].mxu0 }
 0x498   :  { %v482_v17 = vrot.slane %v480_v9, 3  ;;  %v483_v18 = vrot.slane %v480_v9, 4  ;;  %900 = vrot.lane.b32.xlu0 %v480_v9, %s1334_s0 }
 0x49a   :  { %v486_v19 = vsub.f32 %v1421_v14, %v482_v17  ;;  %v487_v21 = vsub.f32 %v1423_v15, %v483_v18 }
 0x49c   :  { %v490_v22 = vrot.slane %v486_v19, 5  ;;  %v491_v23 = vrot.slane %v487_v21, 4 }
 0x49e   :  { %v492_v24 = vsel %vm47_vm3, %v491_v23, %v490_v22 }
 0x49f   :  { %980 = vrot.lane.b32.xlu1 %v492_v24, %s1334_s0  ;;  %v494_v25 = vadd.f32 %v492_v24, %v476_v8 }
 0x4a1   :  { %1321 = vtanh.f32 %v494_v25 }
 0x4ab   :  { %v1322_v26 = vpop.eup %1321 }
 0x4ac   :  { %1199 = vmatmul.mubr.msk.f32.vlgmr.msra.gmra.mrb[4].mxu1 %vm52_vm4, %v1322_v26 }
 0x4ad   :  { %1289 = vmatpush3.bf16.msra.mxu1 %v1394_v6  ;;  %1220 = vmatprep.mubr.msk.f32.mxu1 %vm1332_vm0, %v1333_v5 }
 0x4ae   :  { %1290 = vmatprep.subr.bf16.mxu1 %v1331_v1 }
 0x4b1   :  { %1292 = vmatpush3.bf16.msra.mxu1 %v1414_v12 }
 0x4b2   :  { %1299 = vmatprep.subr.bf16.mxu1 %v1331_v1 }
 0x508   :  { %v943_v53 = vpop.permute.xlu1 %942 }
 0x511   :  { %v981_v55 = vpop.permute.xlu1 %980 }
 0x57f   :  { %v565_v27 = vpop.f32.mrb[4].mxu1 }
 0x580   :  { %v569_v28 = vmul.f32 %v1419_v13, %v565_v27  ;;  %946 = vrot.lane.b32.xlu1 %v565_v27, %s1335_s1  ;;  %v1200_v29 = vpop.f32.mrb[5].mxu1 }
 0x582   :  { %v571_v30 = vrot.slane %v569_v28, 2  ;;  %v572_v31 = vrot.slane %v569_v28, 3 }
 0x584   :  { %903 = vrot.lane.b32.xlu1 %v569_v28, %s1335_s1  ;;  %v575_v32 = vsub.f32 %v1421_v14, %v571_v30  ;;  %v576_v33 = vsub.f32 %v1423_v15, %v572_v31 }
 0x586   :  { %v579_v34 = vrot.slane %v575_v32, 6  ;;  %v580_v35 = vrot.slane %v576_v33, 5 }
 0x588   :  { %v581_v36 = vsel %vm47_vm3, %v580_v35, %v579_v34 }
 0x589   :  { %983 = vrot.lane.b32.xlu1 %v581_v36, %s1335_s1  ;;  %v583_v37 = vadd.f32 %v581_v36, %v565_v27 }
 0x58b   :  { %1323 = vtanh.f32 %v583_v37 }
 0x595   :  { %v1324_v38 = vpop.eup %1323 }
 0x596   :  { %1210 = vmatmul.mubr.msk.f32.vlgmr.msra.gmra.mrb[6].mxu0 %vm52_vm4, %v1324_v38 }
 0x597   :  { %1295 = vmatpush3.bf16.msra.mxu0 %v1394_v6  ;;  %1231 = vmatprep.mubr.msk.f32.mxu0 %vm1332_vm0, %v1333_v5 }
 0x598   :  { %1296 = vmatprep.subr.bf16.mxu0 %v1331_v1 }
 0x59b   :  { %1298 = vmatpush3.bf16.msra.mxu0 %v1414_v12 }
 0x5f2   :  { %v947_v59 = vpop.permute.xlu1 %946 }
 0x5f6   :  { %v904_v61 = vpop.permute.xlu1 %903 }
 0x5fb   :  { %v984_v62 = vpop.permute.xlu1 %983 }
 0x669   :  { %v1541_v39 = vpop.f32.mrb[6].mxu0 }
 0x66a   :  { %v1545_v40 = vmul.f32 %v1419_v13, %v1541_v39  ;;  %1325 = vtanh.f32 %v1541_v39  ;;  %950 = vrot.lane.b32.xlu1 %v1541_v39, %s1336_s2  ;;  %v1211_v41 = vpop.f32.mrb[7].mxu0 }
 0x66c   :  { %v660_v42 = vrot.slane %v1545_v40, 2  ;;  %v661_v43 = vrot.slane %v1545_v40, 3 }
 0x66e   :  { %906 = vrot.lane.b32.xlu1 %v1545_v40, %s1336_s2  ;;  %v664_v44 = vsub.f32 %v1421_v14, %v660_v42  ;;  %v665_v45 = vsub.f32 %v1423_v15, %v661_v43  ;;  %v892_v14 = vpop.permute.xlu0 %891 }
 0x66f   :  { %v909_v9 = vsel %vm52_vm4, %v1428_v16, %v892_v14 }
 0x670   :  { %v988_v46 = vrot.slane %v664_v44, 6  ;;  %v989_v47 = vrot.slane %v665_v45, 5 }
 0x672   :  { %v990_v48 = vsel %vm47_vm3, %v989_v47, %v988_v46  ;;  %v972_v15 = vpop.permute.xlu0 %971 }
 0x673   :  { %991 = vrot.lane.b32.xlu1 %v990_v48, %s1336_s2  ;;  %v994_v16 = vsel %vm52_vm4, %v1439_v20, %v972_v15 }
 0x674   :  { %v1326_v49 = vpop.eup %1325 }
 0x675   :  { %1221 = vmatmul.mubr.msk.f32.vlgmr.msra.gmra.mrb[6].mxu1 %vm52_vm4, %v1326_v49 }
 0x676   :  { %1301 = vmatpush3.bf16.msra.mxu1 %v1394_v6  ;;  %1242 = vmatprep.mubr.msk.f32.mxu1 %vm1332_vm0, %v1333_v5  ;;  %v935_v50 = vpop.permute.xlu0 %934  ;;  %v956_v5 = vsel %vm52_vm4, %v1492_v57, %v943_v53 }
 0x677   :  { %1302 = vmatprep.subr.bf16.mxu1 %v1331_v1  ;;  %v953_v1 = vsel %vm52_vm4, %v1408_v10, %v931_v51  ;;  %v957_v0 = vsel %vm910_vm5, %v956_v5, %v947_v59 }
 0x67a   :  { %1304 = vmatpush3.bf16.msra.mxu1 %v1414_v12  ;;  %v895_v52 = vpop.permute.xlu0 %894  ;;  %v954_v12 = vsel %vm910_vm5, %v953_v1, %v935_v50 }
 0x67b   :  { %v911_v11 = vsel %vm910_vm5, %v909_v9, %v895_v52 }
 0x67e   :  { %v975_v54 = vpop.permute.xlu0 %974 }
 0x67f   :  { %v995_v22 = vsel %vm910_vm5, %v994_v16, %v975_v54 }
 0x682   :  { %v939_v56 = vpop.permute.xlu0 %938 }
 0x683   :  { %v955_v4 = vsel %vm912_vm6, %v954_v12, %v939_v56 }
 0x686   :  { %v898_v60 = vpop.permute.xlu0 %897 }
 0x687   :  { %v913_v18 = vsel %vm912_vm6, %v911_v11, %v898_v60 }
 0x68a   :  { %v978_v6 = vpop.permute.xlu0 %977 }
 0x68b   :  { %v996_v25 = vsel %vm912_vm6, %v995_v22, %v978_v6 }
 0x68e   :  { %v901_v63 = vpop.permute.xlu0 %900 }
 0x68f   :  { %v914_v10 = vsel %vm52_vm4, %v1496_v58, %v901_v63  ;;  %v997_v58 = vsel %vm52_vm4, %v1503_v3, %v981_v55 }
 0x690   :  { %v915_v57 = vsel %vm910_vm5, %v914_v10, %v904_v61  ;;  %v998_v23 = vsel %vm910_vm5, %v997_v58, %v984_v62 }
 0x6dc   :  { %v951_v2 = vpop.permute.xlu1 %950 }
 0x6dd   :  { %v958_v7 = vsel %vm912_vm6, %v957_v0, %v951_v2 }
 0x6de   :  { %v961_v8 = vcombine.low %v955_v4, %v958_v7 }
 0x6e0   :  { %1082 = vst.sshfl [vmem:[%s1628_s4] sm:$0x33 pattern:$0x76325410] %v961_v8  ;;  %v907_v17 = vpop.permute.xlu1 %906 }
 0x6e1   :  { %v916_v19 = vsel %vm912_vm6, %v915_v57, %v907_v17 }
 0x6e2   :  { %v919_v21 = vcombine.low %v913_v18, %v916_v19 }
 0x6e4   :  { %1081 = vst.sshfl [vmem:[%s1629_s3] sm:$0x33 pattern:$0x76325410] %v919_v21 }
 0x6e5   :  { %v992_v24 = vpop.permute.xlu1 %991 }
 0x6e6   :  { %v999_v26 = vsel %vm912_vm6, %v998_v23, %v992_v24 }
 0x6e7   :  { %v1002_v27 = vcombine.low %v996_v25, %v999_v26 }
 0x6e9   :  { %1083 = vst.sshfl [vmem:[%s1630_s5] sm:$0x33 pattern:$0x76325410] %v1002_v27  ;;  %1084 = vst.sshfl [vmem:[%s1631_s6] sm:$0x33 pattern:$0x76325410] %v1002_v27 }
 0x748   :  { %v736_v20 = vpop.f32.mrb[6].mxu1 }
 0x749   :  { %v740_v3 = vmul.f32 %v1419_v13, %v736_v20  ;;  %1327 = vtanh.f32 %v736_v20  ;;  %v1222_v28 = vpop.f32.mrb[7].mxu1  ;;  %1030 = vrot.lane.b32.xlu1 %v736_v20, %s1334_s0 }
 0x74b   :  { %1014 = vrot.lane.b32.xlu0 %v740_v3, %s1334_s0 }
 0x753   :  { %v1328_v29 = vpop.eup %1327 }
 0x754   :  { %1232 = vmatmul.mubr.msk.f32.vlgmr.msra.gmra.mrb[8].mxu0 %vm52_vm4, %v1328_v29 }
 0x7bb   :  { %v1031_v37 = vpop.permute.xlu1 %1030 }
 0x7bc   :  { %v1041_v43 = vsel %vm52_vm4, %v1541_v39, %v1031_v37 }
 0x7bd   :  { %v1015_v38 = vpop.permute.xlu0 %1014 }
 0x7be   :  { %v1025_v46 = vsel %vm52_vm4, %v1545_v40, %v1015_v38 }
 0x827   :  { %v811_v30 = vpop.f32.mrb[8].mxu0 }
 0x828   :  { %v815_v31 = vmul.f32 %v1419_v13, %v811_v30  ;;  %1329 = vtanh.f32 %v811_v30  ;;  %1034 = vrot.lane.b32.xlu1 %v811_v30, %s1335_s1  ;;  %v1233_v32 = vpop.f32.mrb[9].mxu0 }
 0x82a   :  { %1018 = vrot.lane.b32.xlu0 %v815_v31, %s1335_s1 }
 0x832   :  { %v1330_v33 = vpop.eup %1329 }
 0x833   :  { %1243 = vmatmul.mubr.msk.f32.vlgmr.msra.gmra.mrb[8].mxu1 %vm52_vm4, %v1330_v33 }
 0x89a   :  { %v1035_v41 = vpop.permute.xlu1 %1034 }
 0x89b   :  { %v1042_v44 = vsel %vm910_vm5, %v1041_v43, %v1035_v41 }
 0x89c   :  { %v1019_v42 = vpop.permute.xlu0 %1018 }
 0x89d   :  { %v1026_v47 = vsel %vm910_vm5, %v1025_v46, %v1019_v42 }
 0x906   :  { %v886_v34 = vpop.f32.mrb[8].mxu1 }
 0x907   :  { %v890_v35 = vmul.f32 %v1419_v13, %v886_v34  ;;  %1038 = vrot.lane.b32.xlu1 %v886_v34, %s1336_s2  ;;  %v1244_v36 = vpop.f32.mrb[9].mxu1 }
 0x909   :  { %1022 = vrot.lane.b32.xlu0 %v890_v35, %s1336_s2 }
 0x979   :  { %v1039_v45 = vpop.permute.xlu1 %1038 }
 0x97a   :  { %v1043_v13 = vsel %vm912_vm6, %v1042_v44, %v1039_v45 }
 0x97b   :  { %1044 = vst [vmem:[%s1632_s8] sm:$0x3] %v1043_v13  ;;  %v1023_v48 = vpop.permute.xlu0 %1022 }
 0x97c   :  { %v1027_v49 = vsel %vm912_vm6, %v1026_v47, %v1023_v48 }
 0x97d   :  { %1028 = vst [vmem:[%s1633_s7] sm:$0x3] %v1027_v49 }

</bundles_post_ra>
